<compile_context>
chip_gen: v7x
topology: tpu7x:2x2x1
jax: 0.10.0
libtpu: 0.0.40
codegen_flags: <defaults>
</compile_context>

<pallas_src>
import jax
import jax.numpy as jnp
from jax import lax
from jax.experimental import pallas as pl
from jax.experimental.pallas import tpu as pltpu


def make_attention_kernel(block_b, N, C, H, Dh, eps, mxu_dtype):
    HD = H * Dh

    def kernel(x_ref, gamma_ref, beta_ref, wqkv_ref, wo_ref, bo_ref, o_ref):
        Bt = block_b
        x = x_ref[...].astype(jnp.float32)                         # [Bt, N, C]

        # --- GroupNorm(num_groups=1): stats over all N*C values per element ---
        mean = jnp.mean(x, axis=(1, 2), keepdims=True)             # [Bt, 1, 1]
        var = jnp.mean((x - mean) ** 2, axis=(1, 2), keepdims=True)
        y = (x - mean) * lax.rsqrt(var + eps)
        y = y * gamma_ref[...].reshape(1, 1, C) + beta_ref[...].reshape(1, 1, C)

        # --- fused QKV projection: one [Bt*N, C] @ [C, 3*H*Dh] matmul.
        #     Weights arrive pre-cast to bf16 with `scale` folded into the
        #     q columns (wrapper-side constant folding).
        y2 = y.reshape(Bt * N, C).astype(mxu_dtype)                # leading-dim merge: free
        qkv = jnp.dot(y2, wqkv_ref[...],
                      preferred_element_type=jnp.float32)          # [Bt*N, 3*H*Dh] f32

        # --- per-head attention with the output projection folded into the
        #     head loop (f32 accumulation).  No lane-dim concat of head chunks;
        #     each head's temporaries are dead after its contribution is added.
        out_acc = jnp.zeros((Bt * N, C), jnp.float32)
        for h in range(H):
            q3 = qkv[:, 0 * HD + h * Dh:0 * HD + (h + 1) * Dh]
            k3 = qkv[:, 1 * HD + h * Dh:1 * HD + (h + 1) * Dh]
            v3 = qkv[:, 2 * HD + h * Dh:2 * HD + (h + 1) * Dh]
            q3 = q3.astype(mxu_dtype).reshape(Bt, N, Dh)
            k3 = k3.astype(mxu_dtype).reshape(Bt, N, Dh)
            v3 = v3.astype(mxu_dtype).reshape(Bt, N, Dh)

            # NT matmul: contract last dims, batch over Bt (no k transpose).
            s = lax.dot_general(q3, k3, (((2,), (2,)), ((0,), (0,))),
                                preferred_element_type=jnp.float32)     # [Bt, N, N]
            s = s - jnp.max(s, axis=-1, keepdims=True)
            p = jnp.exp(s)
            denom = jnp.sum(p, axis=-1, keepdims=True)
            # approx EUP reciprocal: softmax rows sum to 1 within ~1e-3 rel.
            p = p * pl.reciprocal(denom, approx=True)

            o3 = lax.dot_general(p.astype(mxu_dtype), v3,
                                 (((2,), (1,)), ((0,), (0,))),
                                 preferred_element_type=jnp.float32)    # [Bt, N, Dh]

            wo_h = wo_ref[h * Dh:(h + 1) * Dh, :]                        # [Dh, C] bf16
            out_acc = out_acc + jnp.dot(o3.reshape(Bt * N, Dh).astype(mxu_dtype),
                                        wo_h, preferred_element_type=jnp.float32)

        # --- bias + residual, then lane-dense store ---
        out3 = out_acc.reshape(Bt, N, C) + bo_ref[...].reshape(1, 1, C) + x
        out3 = out3.astype(o_ref.dtype)                            # [Bt, N, C]

        # o_ref block is [Bt, 1, N*C]: writing per-point C-chunks at lane offset
        # n*C keeps the output VMEM buffer (and its HBM writeback DMA) lane-dense
        # without any minor-dim reshape of the value.
        for n in range(N):
            o_ref[:, 0, n * C:(n + 1) * C] = out3[:, n, :]

    return kernel


def _tpu_vmem_capacity_bytes(default=64 * 1024 * 1024):
    try:
        return int(pltpu.get_tpu_info().vmem_capacity_bytes)
    except Exception:
        return default   # conservative (v7x-sized) fallback


def _per_element_act_bytes(N, C, H, Dh):
    # Rough f32 working set per batch element inside the kernel:
    # x+y+out (3*N*C) + qkv + per-head o (4*N*H*Dh) + score/prob (2*N*N).
    return 4 * (3 * N * C + 4 * N * H * Dh + 2 * N * N)


def _choose_block_b(B, N, C, H, Dh, vmem_cap):
    per_elem = max(1, _per_element_act_bytes(N, C, H, Dh))
    act_budget = max(per_elem, vmem_cap // 4)
    bb = max(1, min(B, act_budget // per_elem))
    # v7x-class parts (64 MiB VMEM, 2 TensorCores): keep >= 2 "parallel" grid
    # steps so megacore shards them.  Single-TC v5e/v6e (128 MiB): one big step
    # (the grid is a serial loop there, extra steps are pure overhead).
    if vmem_cap < 100 * 1024 * 1024 and B >= 2:
        bb = min(bb, max(1, B // 2))
    while B % bb:
        bb -= 1
    return bb


def _vmem_limit_bytes(block_b, N, C, H, Dh, vmem_cap, x_itemsize):
    blk_in = block_b * N * C * x_itemsize
    blk_out = block_b * N * C * 4
    weights = 2 * (C * 3 * H * Dh + H * Dh * C) + 3 * C * 4
    act = block_b * _per_element_act_bytes(N, C, H, Dh)
    est = 2 * (blk_in + blk_out) + 2 * weights + act      # double-buffered blocks
    return int(min(int(0.8 * vmem_cap), max(32 * 1024 * 1024, 4 * est)))


def attention_pallas(x, gamma, beta, w_qkv, w_out, b_out, *,
                     num_head, ch_head, block_b=None, eps=1e-5,
                     mxu_dtype=jnp.bfloat16):
    B, N, C = x.shape
    H, Dh = num_head, ch_head
    HD = H * Dh
    assert w_qkv.shape == (C, 3 * HD)
    assert w_out.shape == (HD, C)
    scale = float(Dh) ** -0.5

    vmem_cap = _tpu_vmem_capacity_bytes()
    if block_b is None:
        block_b = _choose_block_b(B, N, C, H, Dh, vmem_cap)
    assert B % block_b == 0
    grid_b = B // block_b

    # One-time wrapper-side weight transforms (constant folding, not activation
    # pre-scaling): fold attention scale into the q columns, pre-cast to bf16.
    w_qkv_f = jnp.concatenate([w_qkv[:, :HD] * scale, w_qkv[:, HD:]], axis=1)
    w_qkv_f = w_qkv_f.astype(mxu_dtype)
    w_out_f = w_out.astype(mxu_dtype)

    gamma2 = gamma.reshape(1, C).astype(jnp.float32)
    beta2 = beta.reshape(1, C).astype(jnp.float32)
    bo2 = b_out.reshape(1, C).astype(jnp.float32)

    kernel = make_attention_kernel(block_b, N, C, H, Dh, eps, mxu_dtype)

    out_flat = pl.pallas_call(
        kernel,
        # Lane-dense output slab: last dim N*C (128 at demo shapes).
        out_shape=jax.ShapeDtypeStruct((B, 1, N * C), x.dtype),
        grid_spec=pltpu.PrefetchScalarGridSpec(
            num_scalar_prefetch=0,
            grid=(grid_b,),
            in_specs=[
                pl.BlockSpec((block_b, N, C), lambda g: (g, 0, 0)),   # x
                pl.BlockSpec((1, C), lambda g: (0, 0)),               # gamma
                pl.BlockSpec((1, C), lambda g: (0, 0)),               # beta
                pl.BlockSpec((C, 3 * HD), lambda g: (0, 0)),          # W_qkv (scale folded, bf16)
                pl.BlockSpec((HD, C), lambda g: (0, 0)),              # W_out (bf16)
                pl.BlockSpec((1, C), lambda g: (0, 0)),               # b_out
            ],
            out_specs=pl.BlockSpec((block_b, 1, N * C), lambda g: (g, 0, 0)),
        ),
        compiler_params=pltpu.CompilerParams(
            dimension_semantics=("parallel",),
            vmem_limit_bytes=_vmem_limit_bytes(block_b, N, C, H, Dh, vmem_cap,
                                               x.dtype.itemsize),
        ),
    )(x, gamma2, beta2, w_qkv_f, w_out_f, bo2)

    return out_flat.reshape(B, N, C)


def attention_reference(x, gamma, beta, w_qkv, w_out, b_out, *,
                        num_head, ch_head, eps=1e-5):
    """Pure-JAX f32 reference mirroring the PyTorch module (dense per-batch layout)."""
    B, N, C = x.shape
    H, Dh = num_head, ch_head
    scale = float(Dh) ** -0.5

    mean = x.mean(axis=(1, 2), keepdims=True)
    var = ((x - mean) ** 2).mean(axis=(1, 2), keepdims=True)
    y = (x - mean) / jnp.sqrt(var + eps) * gamma + beta

    qkv = y @ w_qkv                                            # [B, N, 3*H*Dh]
    q, k, v = jnp.split(qkv, 3, axis=-1)
    q = q.reshape(B, N, H, Dh) * scale
    k = k.reshape(B, N, H, Dh)
    v = v.reshape(B, N, H, Dh)
    s = jnp.einsum('bihd,bjhd->bhij', q, k)
    p = jax.nn.softmax(s, axis=-1)
    o = jnp.einsum('bhij,bjhd->bihd', p, v).reshape(B, N, H * Dh)
    return o @ w_out + b_out + x


if __name__ == "__main__":
    # Small shapes consistent with the module defaults (num_head=4, ch_head=32).
    B, N, C = 2, 16, 8
    H, Dh = 4, 32

    key = jax.random.PRNGKey(0)
    k_x, k_qkv, k_out, k_bout = jax.random.split(key, 4)

    x = jax.random.normal(k_x, (B, N, C), dtype=jnp.float32)

    # GroupNorm affine params (PyTorch init: weight=1, bias=0).
    gamma = jnp.ones((C,), jnp.float32)
    beta = jnp.zeros((C,), jnp.float32)

    # to_qkv: C -> 3*H*Dh, no bias.  Column layout matches qkv.F.chunk(3, dim=1)
    # followed by reshape(-1, H, Dh): head slower, Dh fastest.
    w_qkv = jax.random.normal(k_qkv, (C, 3 * H * Dh), dtype=jnp.float32) * 0.05
    # to_out: H*Dh -> C, with bias.  Row layout matches reshape(-1, H*Dh).
    w_out = jax.random.normal(k_out, (H * Dh, C), dtype=jnp.float32) * 0.05
    b_out = jax.random.normal(k_bout, (C,), dtype=jnp.float32) * 0.05

    out = attention_pallas(x, gamma, beta, w_qkv, w_out, b_out,
                           num_head=H, ch_head=Dh)
    out = jax.block_until_ready(out)

    ref = attention_reference(x, gamma, beta, w_qkv, w_out, b_out,
                              num_head=H, ch_head=Dh)
    ref = jax.block_until_ready(ref)

    assert out.shape == (B, N, C)
    max_err = float(jnp.max(jnp.abs(out - ref)))
    # Tolerance loosened vs. pure-f32 because the kernel uses bf16 MXU inputs
    # (f32 accumulation) and an approximate softmax reciprocal.
    assert jnp.allclose(out, ref, atol=2e-2, rtol=2e-2), \
        f"mismatch vs reference (max_abs_err={max_err})"
    print("KERNEL_OK")
</pallas_src>

<mosaic_0001>
module attributes {stable_mosaic.version = 11 : i64} {
  func.func @kernel(%arg0: i32, %arg1: memref<1x16x8xf32, #tpu.memory_space<vmem>>, %arg2: memref<1x8xf32, #tpu.memory_space<vmem>>, %arg3: memref<1x8xf32, #tpu.memory_space<vmem>>, %arg4: memref<8x384xbf16, #tpu.memory_space<vmem>>, %arg5: memref<128x8xbf16, #tpu.memory_space<vmem>>, %arg6: memref<1x8xf32, #tpu.memory_space<vmem>>, %arg7: memref<1x1x128xf32, #tpu.memory_space<vmem>>) attributes {dimension_semantics = [#tpu.dimension_semantics<parallel>], iteration_bounds = array<i64: 2>, scalar_prefetch = 0 : i64, scratch_operands = 0 : i64, tpu.core_type = #tpu.core_type<tc>, window_params = [{transform_indices = @transform_0, window_bounds = array<i64: 1, 16, 8>}, {pipeline_mode = #tpu.pipeline_mode<synchronous>, transform_indices = @transform_1, window_bounds = array<i64: 1, 8>}, {pipeline_mode = #tpu.pipeline_mode<synchronous>, transform_indices = @transform_2, window_bounds = array<i64: 1, 8>}, {pipeline_mode = #tpu.pipeline_mode<synchronous>, transform_indices = @transform_3, window_bounds = array<i64: 8, 384>}, {pipeline_mode = #tpu.pipeline_mode<synchronous>, transform_indices = @transform_4, window_bounds = array<i64: 128, 8>}, {pipeline_mode = #tpu.pipeline_mode<synchronous>, transform_indices = @transform_5, window_bounds = array<i64: 1, 8>}, {transform_indices = @transform_6, window_bounds = array<i64: 1, 1, 128>}]} {
    %c0 = arith.constant 0 : index
    %c0_0 = arith.constant 0 : index
    %c0_1 = arith.constant 0 : index
    %0 = vector.load %arg1[%c0, %c0_0, %c0_1] : memref<1x16x8xf32, #tpu.memory_space<vmem>>, vector<1x16x8xf32>
    %cst = arith.constant dense<0.000000e+00> : vector<1xf32>
    %1 = vector.multi_reduction <add>, %0, %cst [1, 2] : vector<1x16x8xf32> to vector<1xf32>
    %2 = vector.shape_cast %1 : vector<1xf32> to vector<1x1x1xf32>
    %cst_2 = arith.constant 1.280000e+02 : f32
    %3 = vector.broadcast %cst_2 : f32 to vector<1x1x1xf32>
    %4 = arith.divf %2, %3 : vector<1x1x1xf32>
    %5 = vector.broadcast %4 : vector<1x1x1xf32> to vector<1x16x8xf32>
    %6 = arith.subf %0, %5 : vector<1x16x8xf32>
    %7 = arith.mulf %6, %6 : vector<1x16x8xf32>
    %cst_3 = arith.constant dense<0.000000e+00> : vector<1xf32>
    %8 = vector.multi_reduction <add>, %7, %cst_3 [1, 2] : vector<1x16x8xf32> to vector<1xf32>
    %9 = vector.shape_cast %8 : vector<1xf32> to vector<1x1x1xf32>
    %cst_4 = arith.constant 1.280000e+02 : f32
    %10 = vector.broadcast %cst_4 : f32 to vector<1x1x1xf32>
    %11 = arith.divf %9, %10 : vector<1x1x1xf32>
    %12 = vector.broadcast %4 : vector<1x1x1xf32> to vector<1x16x8xf32>
    %13 = arith.subf %0, %12 : vector<1x16x8xf32>
    %cst_5 = arith.constant 9.99999974E-6 : f32
    %14 = vector.broadcast %cst_5 : f32 to vector<1x1x1xf32>
    %15 = arith.addf %11, %14 : vector<1x1x1xf32>
    %16 = math.rsqrt %15 : vector<1x1x1xf32>
    %17 = vector.broadcast %16 : vector<1x1x1xf32> to vector<1x16x8xf32>
    %18 = arith.mulf %13, %17 : vector<1x16x8xf32>
    %c0_6 = arith.constant 0 : index
    %c0_7 = arith.constant 0 : index
    %19 = vector.load %arg2[%c0_6, %c0_7] : memref<1x8xf32, #tpu.memory_space<vmem>>, vector<1x8xf32>
    %20 = vector.shape_cast %19 : vector<1x8xf32> to vector<1x1x8xf32>
    %21 = vector.broadcast %20 : vector<1x1x8xf32> to vector<1x16x8xf32>
    %22 = arith.mulf %18, %21 : vector<1x16x8xf32>
    %c0_8 = arith.constant 0 : index
    %c0_9 = arith.constant 0 : index
    %23 = vector.load %arg3[%c0_8, %c0_9] : memref<1x8xf32, #tpu.memory_space<vmem>>, vector<1x8xf32>
    %24 = vector.shape_cast %23 : vector<1x8xf32> to vector<1x1x8xf32>
    %25 = vector.broadcast %24 : vector<1x1x8xf32> to vector<1x16x8xf32>
    %26 = arith.addf %22, %25 : vector<1x16x8xf32>
    %27 = vector.shape_cast %26 : vector<1x16x8xf32> to vector<16x8xf32>
    %28 = arith.truncf %27 : vector<16x8xf32> to vector<16x8xbf16>
    %c0_10 = arith.constant 0 : index
    %c0_11 = arith.constant 0 : index
    %29 = vector.load %arg4[%c0_10, %c0_11] : memref<8x384xbf16, #tpu.memory_space<vmem>>, vector<8x384xbf16>
    %cst_12 = arith.constant dense<0.000000e+00> : vector<16x384xf32>
    %30 = tpu.matmul %28, %29, %cst_12 {dimension_numbers = #tpu.dot_dimension_numbers<[1], [0], [0], [1], [0, 0, 1, 1], [], []>} : vector<16x8xbf16>, vector<8x384xbf16>, vector<16x384xf32> -> vector<16x384xf32>
    %cst_13 = arith.constant 0.000000e+00 : f32
    %31 = vector.broadcast %cst_13 : f32 to vector<16x8xf32>
    %32 = vector.extract_strided_slice %30 {offsets = [0, 0], sizes = [16, 32], strides = [1, 1]} : vector<16x384xf32> to vector<16x32xf32>
    %33 = vector.extract_strided_slice %30 {offsets = [0, 128], sizes = [16, 32], strides = [1, 1]} : vector<16x384xf32> to vector<16x32xf32>
    %34 = vector.extract_strided_slice %30 {offsets = [0, 256], sizes = [16, 32], strides = [1, 1]} : vector<16x384xf32> to vector<16x32xf32>
    %35 = arith.truncf %32 : vector<16x32xf32> to vector<16x32xbf16>
    %36 = vector.shape_cast %35 : vector<16x32xbf16> to vector<1x16x32xbf16>
    %37 = arith.truncf %33 : vector<16x32xf32> to vector<16x32xbf16>
    %38 = vector.shape_cast %37 : vector<16x32xbf16> to vector<1x16x32xbf16>
    %39 = arith.truncf %34 : vector<16x32xf32> to vector<16x32xbf16>
    %40 = vector.shape_cast %39 : vector<16x32xbf16> to vector<1x16x32xbf16>
    %cst_14 = arith.constant dense<0.000000e+00> : vector<1x16x16xf32>
    %41 = tpu.matmul %36, %38, %cst_14 {dimension_numbers = #tpu.dot_dimension_numbers<[2], [2], [1], [1], [0, 0, 0, 1, 1, 1], [0], [0]>} : vector<1x16x32xbf16>, vector<1x16x32xbf16>, vector<1x16x16xf32> -> vector<1x16x16xf32>
    %cst_15 = arith.constant dense<0xFF800000> : vector<1x16xf32>
    %42 = vector.multi_reduction <maximumf>, %41, %cst_15 [2] : vector<1x16x16xf32> to vector<1x16xf32>
    %43 = vector.shape_cast %42 : vector<1x16xf32> to vector<1x16x1xf32>
    %44 = vector.broadcast %43 : vector<1x16x1xf32> to vector<1x16x16xf32>
    %45 = arith.subf %41, %44 : vector<1x16x16xf32>
    %46 = math.exp %45 : vector<1x16x16xf32>
    %cst_16 = arith.constant dense<0.000000e+00> : vector<1x16xf32>
    %47 = vector.multi_reduction <add>, %46, %cst_16 [2] : vector<1x16x16xf32> to vector<1x16xf32>
    %48 = vector.shape_cast %47 : vector<1x16xf32> to vector<1x16x1xf32>
    %49 = tpu.reciprocal %48 {approx = true} : vector<1x16x1xf32> -> vector<1x16x1xf32>
    %50 = vector.broadcast %49 : vector<1x16x1xf32> to vector<1x16x16xf32>
    %51 = arith.mulf %46, %50 : vector<1x16x16xf32>
    %52 = arith.truncf %51 : vector<1x16x16xf32> to vector<1x16x16xbf16>
    %cst_17 = arith.constant dense<0.000000e+00> : vector<1x16x32xf32>
    %53 = tpu.matmul %52, %40, %cst_17 {dimension_numbers = #tpu.dot_dimension_numbers<[2], [1], [1], [2], [0, 0, 0, 1, 1, 2], [0], [0]>} : vector<1x16x16xbf16>, vector<1x16x32xbf16>, vector<1x16x32xf32> -> vector<1x16x32xf32>
    %c0_18 = arith.constant 0 : index
    %c0_19 = arith.constant 0 : index
    %54 = vector.load %arg5[%c0_18, %c0_19] : memref<128x8xbf16, #tpu.memory_space<vmem>>, vector<32x8xbf16>
    %55 = vector.shape_cast %53 : vector<1x16x32xf32> to vector<16x32xf32>
    %56 = arith.truncf %55 : vector<16x32xf32> to vector<16x32xbf16>
    %cst_20 = arith.constant dense<0.000000e+00> : vector<16x8xf32>
    %57 = tpu.matmul %56, %54, %cst_20 {dimension_numbers = #tpu.dot_dimension_numbers<[1], [0], [0], [1], [0, 0, 1, 1], [], []>} : vector<16x32xbf16>, vector<32x8xbf16>, vector<16x8xf32> -> vector<16x8xf32>
    %58 = arith.addf %31, %57 : vector<16x8xf32>
    %59 = vector.extract_strided_slice %30 {offsets = [0, 32], sizes = [16, 32], strides = [1, 1]} : vector<16x384xf32> to vector<16x32xf32>
    %60 = vector.extract_strided_slice %30 {offsets = [0, 160], sizes = [16, 32], strides = [1, 1]} : vector<16x384xf32> to vector<16x32xf32>
    %61 = vector.extract_strided_slice %30 {offsets = [0, 288], sizes = [16, 32], strides = [1, 1]} : vector<16x384xf32> to vector<16x32xf32>
    %62 = arith.truncf %59 : vector<16x32xf32> to vector<16x32xbf16>
    %63 = vector.shape_cast %62 : vector<16x32xbf16> to vector<1x16x32xbf16>
    %64 = arith.truncf %60 : vector<16x32xf32> to vector<16x32xbf16>
    %65 = vector.shape_cast %64 : vector<16x32xbf16> to vector<1x16x32xbf16>
    %66 = arith.truncf %61 : vector<16x32xf32> to vector<16x32xbf16>
    %67 = vector.shape_cast %66 : vector<16x32xbf16> to vector<1x16x32xbf16>
    %cst_21 = arith.constant dense<0.000000e+00> : vector<1x16x16xf32>
    %68 = tpu.matmul %63, %65, %cst_21 {dimension_numbers = #tpu.dot_dimension_numbers<[2], [2], [1], [1], [0, 0, 0, 1, 1, 1], [0], [0]>} : vector<1x16x32xbf16>, vector<1x16x32xbf16>, vector<1x16x16xf32> -> vector<1x16x16xf32>
    %cst_22 = arith.constant dense<0xFF800000> : vector<1x16xf32>
    %69 = vector.multi_reduction <maximumf>, %68, %cst_22 [2] : vector<1x16x16xf32> to vector<1x16xf32>
    %70 = vector.shape_cast %69 : vector<1x16xf32> to vector<1x16x1xf32>
    %71 = vector.broadcast %70 : vector<1x16x1xf32> to vector<1x16x16xf32>
    %72 = arith.subf %68, %71 : vector<1x16x16xf32>
    %73 = math.exp %72 : vector<1x16x16xf32>
    %cst_23 = arith.constant dense<0.000000e+00> : vector<1x16xf32>
    %74 = vector.multi_reduction <add>, %73, %cst_23 [2] : vector<1x16x16xf32> to vector<1x16xf32>
    %75 = vector.shape_cast %74 : vector<1x16xf32> to vector<1x16x1xf32>
    %76 = tpu.reciprocal %75 {approx = true} : vector<1x16x1xf32> -> vector<1x16x1xf32>
    %77 = vector.broadcast %76 : vector<1x16x1xf32> to vector<1x16x16xf32>
    %78 = arith.mulf %73, %77 : vector<1x16x16xf32>
    %79 = arith.truncf %78 : vector<1x16x16xf32> to vector<1x16x16xbf16>
    %cst_24 = arith.constant dense<0.000000e+00> : vector<1x16x32xf32>
    %80 = tpu.matmul %79, %67, %cst_24 {dimension_numbers = #tpu.dot_dimension_numbers<[2], [1], [1], [2], [0, 0, 0, 1, 1, 2], [0], [0]>} : vector<1x16x16xbf16>, vector<1x16x32xbf16>, vector<1x16x32xf32> -> vector<1x16x32xf32>
    %c32 = arith.constant 32 : index
    %c0_25 = arith.constant 0 : index
    %81 = vector.load %arg5[%c32, %c0_25] : memref<128x8xbf16, #tpu.memory_space<vmem>>, vector<32x8xbf16>
    %82 = vector.shape_cast %80 : vector<1x16x32xf32> to vector<16x32xf32>
    %83 = arith.truncf %82 : vector<16x32xf32> to vector<16x32xbf16>
    %cst_26 = arith.constant dense<0.000000e+00> : vector<16x8xf32>
    %84 = tpu.matmul %83, %81, %cst_26 {dimension_numbers = #tpu.dot_dimension_numbers<[1], [0], [0], [1], [0, 0, 1, 1], [], []>} : vector<16x32xbf16>, vector<32x8xbf16>, vector<16x8xf32> -> vector<16x8xf32>
    %85 = arith.addf %58, %84 : vector<16x8xf32>
    %86 = vector.extract_strided_slice %30 {offsets = [0, 64], sizes = [16, 32], strides = [1, 1]} : vector<16x384xf32> to vector<16x32xf32>
    %87 = vector.extract_strided_slice %30 {offsets = [0, 192], sizes = [16, 32], strides = [1, 1]} : vector<16x384xf32> to vector<16x32xf32>
    %88 = vector.extract_strided_slice %30 {offsets = [0, 320], sizes = [16, 32], strides = [1, 1]} : vector<16x384xf32> to vector<16x32xf32>
    %89 = arith.truncf %86 : vector<16x32xf32> to vector<16x32xbf16>
    %90 = vector.shape_cast %89 : vector<16x32xbf16> to vector<1x16x32xbf16>
    %91 = arith.truncf %87 : vector<16x32xf32> to vector<16x32xbf16>
    %92 = vector.shape_cast %91 : vector<16x32xbf16> to vector<1x16x32xbf16>
    %93 = arith.truncf %88 : vector<16x32xf32> to vector<16x32xbf16>
    %94 = vector.shape_cast %93 : vector<16x32xbf16> to vector<1x16x32xbf16>
    %cst_27 = arith.constant dense<0.000000e+00> : vector<1x16x16xf32>
    %95 = tpu.matmul %90, %92, %cst_27 {dimension_numbers = #tpu.dot_dimension_numbers<[2], [2], [1], [1], [0, 0, 0, 1, 1, 1], [0], [0]>} : vector<1x16x32xbf16>, vector<1x16x32xbf16>, vector<1x16x16xf32> -> vector<1x16x16xf32>
    %cst_28 = arith.constant dense<0xFF800000> : vector<1x16xf32>
    %96 = vector.multi_reduction <maximumf>, %95, %cst_28 [2] : vector<1x16x16xf32> to vector<1x16xf32>
    %97 = vector.shape_cast %96 : vector<1x16xf32> to vector<1x16x1xf32>
    %98 = vector.broadcast %97 : vector<1x16x1xf32> to vector<1x16x16xf32>
    %99 = arith.subf %95, %98 : vector<1x16x16xf32>
    %100 = math.exp %99 : vector<1x16x16xf32>
    %cst_29 = arith.constant dense<0.000000e+00> : vector<1x16xf32>
    %101 = vector.multi_reduction <add>, %100, %cst_29 [2] : vector<1x16x16xf32> to vector<1x16xf32>
    %102 = vector.shape_cast %101 : vector<1x16xf32> to vector<1x16x1xf32>
    %103 = tpu.reciprocal %102 {approx = true} : vector<1x16x1xf32> -> vector<1x16x1xf32>
    %104 = vector.broadcast %103 : vector<1x16x1xf32> to vector<1x16x16xf32>
    %105 = arith.mulf %100, %104 : vector<1x16x16xf32>
    %106 = arith.truncf %105 : vector<1x16x16xf32> to vector<1x16x16xbf16>
    %cst_30 = arith.constant dense<0.000000e+00> : vector<1x16x32xf32>
    %107 = tpu.matmul %106, %94, %cst_30 {dimension_numbers = #tpu.dot_dimension_numbers<[2], [1], [1], [2], [0, 0, 0, 1, 1, 2], [0], [0]>} : vector<1x16x16xbf16>, vector<1x16x32xbf16>, vector<1x16x32xf32> -> vector<1x16x32xf32>
    %c64 = arith.constant 64 : index
    %c0_31 = arith.constant 0 : index
    %108 = vector.load %arg5[%c64, %c0_31] : memref<128x8xbf16, #tpu.memory_space<vmem>>, vector<32x8xbf16>
    %109 = vector.shape_cast %107 : vector<1x16x32xf32> to vector<16x32xf32>
    %110 = arith.truncf %109 : vector<16x32xf32> to vector<16x32xbf16>
    %cst_32 = arith.constant dense<0.000000e+00> : vector<16x8xf32>
    %111 = tpu.matmul %110, %108, %cst_32 {dimension_numbers = #tpu.dot_dimension_numbers<[1], [0], [0], [1], [0, 0, 1, 1], [], []>} : vector<16x32xbf16>, vector<32x8xbf16>, vector<16x8xf32> -> vector<16x8xf32>
    %112 = arith.addf %85, %111 : vector<16x8xf32>
    %113 = vector.extract_strided_slice %30 {offsets = [0, 96], sizes = [16, 32], strides = [1, 1]} : vector<16x384xf32> to vector<16x32xf32>
    %114 = vector.extract_strided_slice %30 {offsets = [0, 224], sizes = [16, 32], strides = [1, 1]} : vector<16x384xf32> to vector<16x32xf32>
    %115 = vector.extract_strided_slice %30 {offsets = [0, 352], sizes = [16, 32], strides = [1, 1]} : vector<16x384xf32> to vector<16x32xf32>
    %116 = arith.truncf %113 : vector<16x32xf32> to vector<16x32xbf16>
    %117 = vector.shape_cast %116 : vector<16x32xbf16> to vector<1x16x32xbf16>
    %118 = arith.truncf %114 : vector<16x32xf32> to vector<16x32xbf16>
    %119 = vector.shape_cast %118 : vector<16x32xbf16> to vector<1x16x32xbf16>
    %120 = arith.truncf %115 : vector<16x32xf32> to vector<16x32xbf16>
    %121 = vector.shape_cast %120 : vector<16x32xbf16> to vector<1x16x32xbf16>
    %cst_33 = arith.constant dense<0.000000e+00> : vector<1x16x16xf32>
    %122 = tpu.matmul %117, %119, %cst_33 {dimension_numbers = #tpu.dot_dimension_numbers<[2], [2], [1], [1], [0, 0, 0, 1, 1, 1], [0], [0]>} : vector<1x16x32xbf16>, vector<1x16x32xbf16>, vector<1x16x16xf32> -> vector<1x16x16xf32>
    %cst_34 = arith.constant dense<0xFF800000> : vector<1x16xf32>
    %123 = vector.multi_reduction <maximumf>, %122, %cst_34 [2] : vector<1x16x16xf32> to vector<1x16xf32>
    %124 = vector.shape_cast %123 : vector<1x16xf32> to vector<1x16x1xf32>
    %125 = vector.broadcast %124 : vector<1x16x1xf32> to vector<1x16x16xf32>
    %126 = arith.subf %122, %125 : vector<1x16x16xf32>
    %127 = math.exp %126 : vector<1x16x16xf32>
    %cst_35 = arith.constant dense<0.000000e+00> : vector<1x16xf32>
    %128 = vector.multi_reduction <add>, %127, %cst_35 [2] : vector<1x16x16xf32> to vector<1x16xf32>
    %129 = vector.shape_cast %128 : vector<1x16xf32> to vector<1x16x1xf32>
    %130 = tpu.reciprocal %129 {approx = true} : vector<1x16x1xf32> -> vector<1x16x1xf32>
    %131 = vector.broadcast %130 : vector<1x16x1xf32> to vector<1x16x16xf32>
    %132 = arith.mulf %127, %131 : vector<1x16x16xf32>
    %133 = arith.truncf %132 : vector<1x16x16xf32> to vector<1x16x16xbf16>
    %cst_36 = arith.constant dense<0.000000e+00> : vector<1x16x32xf32>
    %134 = tpu.matmul %133, %121, %cst_36 {dimension_numbers = #tpu.dot_dimension_numbers<[2], [1], [1], [2], [0, 0, 0, 1, 1, 2], [0], [0]>} : vector<1x16x16xbf16>, vector<1x16x32xbf16>, vector<1x16x32xf32> -> vector<1x16x32xf32>
    %c96 = arith.constant 96 : index
    %c0_37 = arith.constant 0 : index
    %135 = vector.load %arg5[%c96, %c0_37] : memref<128x8xbf16, #tpu.memory_space<vmem>>, vector<32x8xbf16>
    %136 = vector.shape_cast %134 : vector<1x16x32xf32> to vector<16x32xf32>
    %137 = arith.truncf %136 : vector<16x32xf32> to vector<16x32xbf16>
    %cst_38 = arith.constant dense<0.000000e+00> : vector<16x8xf32>
    %138 = tpu.matmul %137, %135, %cst_38 {dimension_numbers = #tpu.dot_dimension_numbers<[1], [0], [0], [1], [0, 0, 1, 1], [], []>} : vector<16x32xbf16>, vector<32x8xbf16>, vector<16x8xf32> -> vector<16x8xf32>
    %139 = arith.addf %112, %138 : vector<16x8xf32>
    %140 = vector.shape_cast %139 : vector<16x8xf32> to vector<1x16x8xf32>
    %c0_39 = arith.constant 0 : index
    %c0_40 = arith.constant 0 : index
    %141 = vector.load %arg6[%c0_39, %c0_40] : memref<1x8xf32, #tpu.memory_space<vmem>>, vector<1x8xf32>
    %142 = vector.shape_cast %141 : vector<1x8xf32> to vector<1x1x8xf32>
    %143 = vector.broadcast %142 : vector<1x1x8xf32> to vector<1x16x8xf32>
    %144 = arith.addf %140, %143 : vector<1x16x8xf32>
    %145 = arith.addf %144, %0 : vector<1x16x8xf32>
    %146 = vector.extract_strided_slice %145 {offsets = [0, 0, 0], sizes = [1, 1, 8], strides = [1, 1, 1]} : vector<1x16x8xf32> to vector<1x1x8xf32>
    %147 = vector.shape_cast %146 : vector<1x1x8xf32> to vector<1x8xf32>
    %c0_41 = arith.constant 0 : index
    %c0_42 = arith.constant 0 : index
    %c0_43 = arith.constant 0 : index
    %148 = vector.load %arg7[%c0_41, %c0_42, %c0_43] : memref<1x1x128xf32, #tpu.memory_space<vmem>>, vector<1x1x8xf32>
    %149 = vector.shape_cast %148 : vector<1x1x8xf32> to vector<1x8xf32>
    %150 = vector.shape_cast %147 : vector<1x8xf32> to vector<1x1x8xf32>
    tpu.vector_store %arg7[%c0_41, %c0_42, %c0_43], %150 {strides = array<i32>} : memref<1x1x128xf32, #tpu.memory_space<vmem>>, vector<1x1x8xf32>,
    %151 = vector.extract_strided_slice %145 {offsets = [0, 1, 0], sizes = [1, 1, 8], strides = [1, 1, 1]} : vector<1x16x8xf32> to vector<1x1x8xf32>
    %152 = vector.shape_cast %151 : vector<1x1x8xf32> to vector<1x8xf32>
    %c0_44 = arith.constant 0 : index
    %c0_45 = arith.constant 0 : index
    %c8 = arith.constant 8 : index
    %153 = vector.load %arg7[%c0_44, %c0_45, %c8] : memref<1x1x128xf32, #tpu.memory_space<vmem>>, vector<1x1x8xf32>
    %154 = vector.shape_cast %153 : vector<1x1x8xf32> to vector<1x8xf32>
    %155 = vector.shape_cast %152 : vector<1x8xf32> to vector<1x1x8xf32>
    tpu.vector_store %arg7[%c0_44, %c0_45, %c8], %155 {strides = array<i32>} : memref<1x1x128xf32, #tpu.memory_space<vmem>>, vector<1x1x8xf32>,
    %156 = vector.extract_strided_slice %145 {offsets = [0, 2, 0], sizes = [1, 1, 8], strides = [1, 1, 1]} : vector<1x16x8xf32> to vector<1x1x8xf32>
    %157 = vector.shape_cast %156 : vector<1x1x8xf32> to vector<1x8xf32>
    %c0_46 = arith.constant 0 : index
    %c0_47 = arith.constant 0 : index
    %c16 = arith.constant 16 : index
    %158 = vector.load %arg7[%c0_46, %c0_47, %c16] : memref<1x1x128xf32, #tpu.memory_space<vmem>>, vector<1x1x8xf32>
    %159 = vector.shape_cast %158 : vector<1x1x8xf32> to vector<1x8xf32>
    %160 = vector.shape_cast %157 : vector<1x8xf32> to vector<1x1x8xf32>
    tpu.vector_store %arg7[%c0_46, %c0_47, %c16], %160 {strides = array<i32>} : memref<1x1x128xf32, #tpu.memory_space<vmem>>, vector<1x1x8xf32>,
    %161 = vector.extract_strided_slice %145 {offsets = [0, 3, 0], sizes = [1, 1, 8], strides = [1, 1, 1]} : vector<1x16x8xf32> to vector<1x1x8xf32>
    %162 = vector.shape_cast %161 : vector<1x1x8xf32> to vector<1x8xf32>
    %c0_48 = arith.constant 0 : index
    %c0_49 = arith.constant 0 : index
    %c24 = arith.constant 24 : index
    %163 = vector.load %arg7[%c0_48, %c0_49, %c24] : memref<1x1x128xf32, #tpu.memory_space<vmem>>, vector<1x1x8xf32>
    %164 = vector.shape_cast %163 : vector<1x1x8xf32> to vector<1x8xf32>
    %165 = vector.shape_cast %162 : vector<1x8xf32> to vector<1x1x8xf32>
    tpu.vector_store %arg7[%c0_48, %c0_49, %c24], %165 {strides = array<i32>} : memref<1x1x128xf32, #tpu.memory_space<vmem>>, vector<1x1x8xf32>,
    %166 = vector.extract_strided_slice %145 {offsets = [0, 4, 0], sizes = [1, 1, 8], strides = [1, 1, 1]} : vector<1x16x8xf32> to vector<1x1x8xf32>
    %167 = vector.shape_cast %166 : vector<1x1x8xf32> to vector<1x8xf32>
    %c0_50 = arith.constant 0 : index
    %c0_51 = arith.constant 0 : index
    %c32_52 = arith.constant 32 : index
    %168 = vector.load %arg7[%c0_50, %c0_51, %c32_52] : memref<1x1x128xf32, #tpu.memory_space<vmem>>, vector<1x1x8xf32>
    %169 = vector.shape_cast %168 : vector<1x1x8xf32> to vector<1x8xf32>
    %170 = vector.shape_cast %167 : vector<1x8xf32> to vector<1x1x8xf32>
    tpu.vector_store %arg7[%c0_50, %c0_51, %c32_52], %170 {strides = array<i32>} : memref<1x1x128xf32, #tpu.memory_space<vmem>>, vector<1x1x8xf32>,
    %171 = vector.extract_strided_slice %145 {offsets = [0, 5, 0], sizes = [1, 1, 8], strides = [1, 1, 1]} : vector<1x16x8xf32> to vector<1x1x8xf32>
    %172 = vector.shape_cast %171 : vector<1x1x8xf32> to vector<1x8xf32>
    %c0_53 = arith.constant 0 : index
    %c0_54 = arith.constant 0 : index
    %c40 = arith.constant 40 : index
    %173 = vector.load %arg7[%c0_53, %c0_54, %c40] : memref<1x1x128xf32, #tpu.memory_space<vmem>>, vector<1x1x8xf32>
    %174 = vector.shape_cast %173 : vector<1x1x8xf32> to vector<1x8xf32>
    %175 = vector.shape_cast %172 : vector<1x8xf32> to vector<1x1x8xf32>
    tpu.vector_store %arg7[%c0_53, %c0_54, %c40], %175 {strides = array<i32>} : memref<1x1x128xf32, #tpu.memory_space<vmem>>, vector<1x1x8xf32>,
    %176 = vector.extract_strided_slice %145 {offsets = [0, 6, 0], sizes = [1, 1, 8], strides = [1, 1, 1]} : vector<1x16x8xf32> to vector<1x1x8xf32>
    %177 = vector.shape_cast %176 : vector<1x1x8xf32> to vector<1x8xf32>
    %c0_55 = arith.constant 0 : index
    %c0_56 = arith.constant 0 : index
    %c48 = arith.constant 48 : index
    %178 = vector.load %arg7[%c0_55, %c0_56, %c48] : memref<1x1x128xf32, #tpu.memory_space<vmem>>, vector<1x1x8xf32>
    %179 = vector.shape_cast %178 : vector<1x1x8xf32> to vector<1x8xf32>
    %180 = vector.shape_cast %177 : vector<1x8xf32> to vector<1x1x8xf32>
    tpu.vector_store %arg7[%c0_55, %c0_56, %c48], %180 {strides = array<i32>} : memref<1x1x128xf32, #tpu.memory_space<vmem>>, vector<1x1x8xf32>,
    %181 = vector.extract_strided_slice %145 {offsets = [0, 7, 0], sizes = [1, 1, 8], strides = [1, 1, 1]} : vector<1x16x8xf32> to vector<1x1x8xf32>
    %182 = vector.shape_cast %181 : vector<1x1x8xf32> to vector<1x8xf32>
    %c0_57 = arith.constant 0 : index
    %c0_58 = arith.constant 0 : index
    %c56 = arith.constant 56 : index
    %183 = vector.load %arg7[%c0_57, %c0_58, %c56] : memref<1x1x128xf32, #tpu.memory_space<vmem>>, vector<1x1x8xf32>
    %184 = vector.shape_cast %183 : vector<1x1x8xf32> to vector<1x8xf32>
    %185 = vector.shape_cast %182 : vector<1x8xf32> to vector<1x1x8xf32>
    tpu.vector_store %arg7[%c0_57, %c0_58, %c56], %185 {strides = array<i32>} : memref<1x1x128xf32, #tpu.memory_space<vmem>>, vector<1x1x8xf32>,
    %186 = vector.extract_strided_slice %145 {offsets = [0, 8, 0], sizes = [1, 1, 8], strides = [1, 1, 1]} : vector<1x16x8xf32> to vector<1x1x8xf32>
    %187 = vector.shape_cast %186 : vector<1x1x8xf32> to vector<1x8xf32>
    %c0_59 = arith.constant 0 : index
    %c0_60 = arith.constant 0 : index
    %c64_61 = arith.constant 64 : index
    %188 = vector.load %arg7[%c0_59, %c0_60, %c64_61] : memref<1x1x128xf32, #tpu.memory_space<vmem>>, vector<1x1x8xf32>
    %189 = vector.shape_cast %188 : vector<1x1x8xf32> to vector<1x8xf32>
    %190 = vector.shape_cast %187 : vector<1x8xf32> to vector<1x1x8xf32>
    tpu.vector_store %arg7[%c0_59, %c0_60, %c64_61], %190 {strides = array<i32>} : memref<1x1x128xf32, #tpu.memory_space<vmem>>, vector<1x1x8xf32>,
    %191 = vector.extract_strided_slice %145 {offsets = [0, 9, 0], sizes = [1, 1, 8], strides = [1, 1, 1]} : vector<1x16x8xf32> to vector<1x1x8xf32>
    %192 = vector.shape_cast %191 : vector<1x1x8xf32> to vector<1x8xf32>
    %c0_62 = arith.constant 0 : index
    %c0_63 = arith.constant 0 : index
    %c72 = arith.constant 72 : index
    %193 = vector.load %arg7[%c0_62, %c0_63, %c72] : memref<1x1x128xf32, #tpu.memory_space<vmem>>, vector<1x1x8xf32>
    %194 = vector.shape_cast %193 : vector<1x1x8xf32> to vector<1x8xf32>
    %195 = vector.shape_cast %192 : vector<1x8xf32> to vector<1x1x8xf32>
    tpu.vector_store %arg7[%c0_62, %c0_63, %c72], %195 {strides = array<i32>} : memref<1x1x128xf32, #tpu.memory_space<vmem>>, vector<1x1x8xf32>,
    %196 = vector.extract_strided_slice %145 {offsets = [0, 10, 0], sizes = [1, 1, 8], strides = [1, 1, 1]} : vector<1x16x8xf32> to vector<1x1x8xf32>
    %197 = vector.shape_cast %196 : vector<1x1x8xf32> to vector<1x8xf32>
    %c0_64 = arith.constant 0 : index
    %c0_65 = arith.constant 0 : index
    %c80 = arith.constant 80 : index
    %198 = vector.load %arg7[%c0_64, %c0_65, %c80] : memref<1x1x128xf32, #tpu.memory_space<vmem>>, vector<1x1x8xf32>
    %199 = vector.shape_cast %198 : vector<1x1x8xf32> to vector<1x8xf32>
    %200 = vector.shape_cast %197 : vector<1x8xf32> to vector<1x1x8xf32>
    tpu.vector_store %arg7[%c0_64, %c0_65, %c80], %200 {strides = array<i32>} : memref<1x1x128xf32, #tpu.memory_space<vmem>>, vector<1x1x8xf32>,
    %201 = vector.extract_strided_slice %145 {offsets = [0, 11, 0], sizes = [1, 1, 8], strides = [1, 1, 1]} : vector<1x16x8xf32> to vector<1x1x8xf32>
    %202 = vector.shape_cast %201 : vector<1x1x8xf32> to vector<1x8xf32>
    %c0_66 = arith.constant 0 : index
    %c0_67 = arith.constant 0 : index
    %c88 = arith.constant 88 : index
    %203 = vector.load %arg7[%c0_66, %c0_67, %c88] : memref<1x1x128xf32, #tpu.memory_space<vmem>>, vector<1x1x8xf32>
    %204 = vector.shape_cast %203 : vector<1x1x8xf32> to vector<1x8xf32>
    %205 = vector.shape_cast %202 : vector<1x8xf32> to vector<1x1x8xf32>
    tpu.vector_store %arg7[%c0_66, %c0_67, %c88], %205 {strides = array<i32>} : memref<1x1x128xf32, #tpu.memory_space<vmem>>, vector<1x1x8xf32>,
    %206 = vector.extract_strided_slice %145 {offsets = [0, 12, 0], sizes = [1, 1, 8], strides = [1, 1, 1]} : vector<1x16x8xf32> to vector<1x1x8xf32>
    %207 = vector.shape_cast %206 : vector<1x1x8xf32> to vector<1x8xf32>
    %c0_68 = arith.constant 0 : index
    %c0_69 = arith.constant 0 : index
    %c96_70 = arith.constant 96 : index
    %208 = vector.load %arg7[%c0_68, %c0_69, %c96_70] : memref<1x1x128xf32, #tpu.memory_space<vmem>>, vector<1x1x8xf32>
    %209 = vector.shape_cast %208 : vector<1x1x8xf32> to vector<1x8xf32>
    %210 = vector.shape_cast %207 : vector<1x8xf32> to vector<1x1x8xf32>
    tpu.vector_store %arg7[%c0_68, %c0_69, %c96_70], %210 {strides = array<i32>} : memref<1x1x128xf32, #tpu.memory_space<vmem>>, vector<1x1x8xf32>,
    %211 = vector.extract_strided_slice %145 {offsets = [0, 13, 0], sizes = [1, 1, 8], strides = [1, 1, 1]} : vector<1x16x8xf32> to vector<1x1x8xf32>
    %212 = vector.shape_cast %211 : vector<1x1x8xf32> to vector<1x8xf32>
    %c0_71 = arith.constant 0 : index
    %c0_72 = arith.constant 0 : index
    %c104 = arith.constant 104 : index
    %213 = vector.load %arg7[%c0_71, %c0_72, %c104] : memref<1x1x128xf32, #tpu.memory_space<vmem>>, vector<1x1x8xf32>
    %214 = vector.shape_cast %213 : vector<1x1x8xf32> to vector<1x8xf32>
    %215 = vector.shape_cast %212 : vector<1x8xf32> to vector<1x1x8xf32>
    tpu.vector_store %arg7[%c0_71, %c0_72, %c104], %215 {strides = array<i32>} : memref<1x1x128xf32, #tpu.memory_space<vmem>>, vector<1x1x8xf32>,
    %216 = vector.extract_strided_slice %145 {offsets = [0, 14, 0], sizes = [1, 1, 8], strides = [1, 1, 1]} : vector<1x16x8xf32> to vector<1x1x8xf32>
    %217 = vector.shape_cast %216 : vector<1x1x8xf32> to vector<1x8xf32>
    %c0_73 = arith.constant 0 : index
    %c0_74 = arith.constant 0 : index
    %c112 = arith.constant 112 : index
    %218 = vector.load %arg7[%c0_73, %c0_74, %c112] : memref<1x1x128xf32, #tpu.memory_space<vmem>>, vector<1x1x8xf32>
    %219 = vector.shape_cast %218 : vector<1x1x8xf32> to vector<1x8xf32>
    %220 = vector.shape_cast %217 : vector<1x8xf32> to vector<1x1x8xf32>
    tpu.vector_store %arg7[%c0_73, %c0_74, %c112], %220 {strides = array<i32>} : memref<1x1x128xf32, #tpu.memory_space<vmem>>, vector<1x1x8xf32>,
    %221 = vector.extract_strided_slice %145 {offsets = [0, 15, 0], sizes = [1, 1, 8], strides = [1, 1, 1]} : vector<1x16x8xf32> to vector<1x1x8xf32>
    %222 = vector.shape_cast %221 : vector<1x1x8xf32> to vector<1x8xf32>
    %c0_75 = arith.constant 0 : index
    %c0_76 = arith.constant 0 : index
    %c120 = arith.constant 120 : index
    %223 = vector.load %arg7[%c0_75, %c0_76, %c120] : memref<1x1x128xf32, #tpu.memory_space<vmem>>, vector<1x1x8xf32>
    %224 = vector.shape_cast %223 : vector<1x1x8xf32> to vector<1x8xf32>
    %225 = vector.shape_cast %222 : vector<1x8xf32> to vector<1x1x8xf32>
    tpu.vector_store %arg7[%c0_75, %c0_76, %c120], %225 {strides = array<i32>} : memref<1x1x128xf32, #tpu.memory_space<vmem>>, vector<1x1x8xf32>,
    return
  }
  func.func @transform_0(%arg0: i32) -> (i32, i32, i32) {
    %c0_i32 = arith.constant 0 : i32
    %c0_i32_0 = arith.constant 0 : i32
    %c0_i32_1 = arith.constant 0 : i32
    return %arg0, %c0_i32, %c0_i32_0 : i32, i32, i32
  }
  func.func @transform_1(%arg0: i32) -> (i32, i32) {
    %c0_i32 = arith.constant 0 : i32
    %c0_i32_0 = arith.constant 0 : i32
    %c0_i32_1 = arith.constant 0 : i32
    return %c0_i32, %c0_i32_0 : i32, i32
  }
  func.func @transform_2(%arg0: i32) -> (i32, i32) {
    %c0_i32 = arith.constant 0 : i32
    %c0_i32_0 = arith.constant 0 : i32
    %c0_i32_1 = arith.constant 0 : i32
    return %c0_i32, %c0_i32_0 : i32, i32
  }
  func.func @transform_3(%arg0: i32) -> (i32, i32) {
    %c0_i32 = arith.constant 0 : i32
    %c0_i32_0 = arith.constant 0 : i32
    %c0_i32_1 = arith.constant 0 : i32
    return %c0_i32, %c0_i32_0 : i32, i32
  }
  func.func @transform_4(%arg0: i32) -> (i32, i32) {
    %c0_i32 = arith.constant 0 : i32
    %c0_i32_0 = arith.constant 0 : i32
    %c0_i32_1 = arith.constant 0 : i32
    return %c0_i32, %c0_i32_0 : i32, i32
  }
  func.func @transform_5(%arg0: i32) -> (i32, i32) {
    %c0_i32 = arith.constant 0 : i32
    %c0_i32_0 = arith.constant 0 : i32
    %c0_i32_1 = arith.constant 0 : i32
    return %c0_i32, %c0_i32_0 : i32, i32
  }
  func.func @transform_6(%arg0: i32) -> (i32, i32, i32) {
    %c0_i32 = arith.constant 0 : i32
    %c0_i32_0 = arith.constant 0 : i32
    %c0_i32_1 = arith.constant 0 : i32
    return %arg0, %c0_i32, %c0_i32_0 : i32, i32, i32
  }
}

</mosaic_0001>

<bundles_post_ra>
// kernel: tpu_custom_call.1
= control target key start
LH: loop header
LB: loop body
LE: loop exit
PB: predicated region body
PF: predicated region fallthrough
CT: control target
= control target key end

     0   :  { %11 = vsyncpa [#allocation3], 0  ;;  %s1967_s0 = inlined_call_operand.vmem [shape: f32[2,16,8], index: 0, kind: input, shape index: {}]   ;;  %s1968_s1 = inlined_call_operand.vmem [shape: f32[1,8], index: 1, kind: input, shape index: {}]   ;;  %s1969_s2 = inlined_call_operand.vmem [shape: f32[1,8], index: 2, kind: input, shape index: {}]   ;;  %s1970_s3 = inlined_call_operand.vmem [shape: bf16[8,384], index: 3, kind: input, shape index: {}]   ;;  %s1971_s4 = inlined_call_operand.vmem [shape: bf16[128,8], index: 4, kind: input, shape index: {}]   ;;  %s1972_s5 = inlined_call_operand.vmem [shape: f32[1,8], index: 5, kind: input, shape index: {}]   ;;  %s1973_s6 = inlined_call_operand.hbm [shape: f32[2,1,128], index: 6, kind: output, shape index: {}]  }
   0x1   :  { %13 = vsyncpa [#allocation3 + $0x1], 0  ;;  %s1678_s21 = smov 0   ;;  %s1680_s22 = smov 0  }
   0x2   :  { %s1682_s23 = smov 0   ;;  %s1684_s24 = smov 0  }
   0x3 LB: > { %s1699_s25 = sadd.s32 4294967295, %s1622_s24   ;;  %s1303_s26 = sadd.s32 4294967294, %s1622_s24   ;;  %s1622_s24 = sphi %s1684_s24, %s1979_s24   ;;  %s1618_s23 = sphi %s1682_s23, %s1978_s23   ;;  %s1614_s22 = sphi %s1680_s22, %s1977_s22   ;;  %s1610_s21 = sphi %s1678_s21, %s1976_s21  }
   0x4   : > { %s1703_s27 = sadd.s32 1, %s1622_s24   ;;  %s157_s28 = sadd.s32 1, %s1618_s23 }
   0x5   : > { %s154_s29 = ssub.s32 %s1622_s24, %s1703_s27  ;;  %p167_p0 = scmp.ne.s32.totalorder %s1618_s23, %s1614_s22 }
   0x6   : > { %p155_p1 = scmp.eq.s32.totalorder %s154_s29, 0  ;;  %p168_p2 = scmp.eq.s32.totalorder %s1699_s25, 1 }
   0x7   : > { %p173_p3 = scmp.ne.s32.totalorder %s1614_s22, %s1610_s21  ;;  %p174_p4 = scmp.eq.s32.totalorder %s1303_s26, 1 }
   0x8   : > { %s1714_s30 = scalar_select %p155_p1, %s1618_s23, %s157_s28  }
   0x9   : > { %p1716_p5 = por %p168_p2, %p167_p0  ;;  %p1720_p6 = por %p174_p4, %p173_p3 }
   0xa   : > { %p1306_p7 = scmp.ge.s32.totalorder %s1622_s24, 1  ;;  %p215_p8 = scmp.lt.s32.totalorder %s1622_s24, 3 }
   0xc   : > { %p216_p9 = pnand %p1306_p7, %p215_p8 }
   0xd   : > { %p244_p10 = scmp.lt.s32.totalorder (!%p216_p9), %s1699_s25, 1  ;;  %vm252_vm0 = vcmask (!%p216_p9), 64512   ;;  %v305_v20 = vld [vmem:[%s1970_s3] sm:$0xff] (!%p216_p9)  ;;  %vm318_vm1 = vcmask (!%p216_p9), 1043456   ;;  %v1517_v21 = vld [vmem:[%s1970_s3 + $0x8] ss:$0 sps:$4 sm:$0xff] (!%p216_p9)  }
   0xe   : > { %219 = sbr.rel (%p216_p9) target bundleno = 3130 (0xc3a), region = 44  ;;  %v1312_v22 = vcombine.high (!%p216_p9), %v305_v20, %v305_v20  ;;  %v1624_v23 = vmov (!%p216_p9), 0.0   ;;  %v1311_v24 = vcombine.low (!%p216_p9), %v305_v20, %v305_v20  ;;  %v1625_v25 = vmov (!%p216_p9), 0   ;;  %v1309_v38 = vld [vmem:[%s1968_s1] ss:$0 sm:$0xff] (!%p216_p9)  ;;  %s1627_s28 = smov (!%p216_p9), 96  }
   0xf   : > { %1372 = vmatprep.subr.bf16.mxu1 (!%p216_p9), %v1624_v23  ;;  %360 = vmatprep.mubr.bf16.mxu0 (!%p216_p9), %v1625_v25  ;;  %v326_v26 = vsel (!%p216_p9), %vm318_vm1, %v1517_v21, 0  ;;  %vm1626_vm2 = vmmov (!%p216_p9), 0   ;;  %v1310_v41 = vld [vmem:[%s1969_s2] ss:$0 sm:$0xff] (!%p216_p9)  ;;  %vm415_vm3 = vcmask (!%p216_p9), 261120   ;;  %vm463_vm4 = vcmask (!%p216_p9), 130048  }
  0x10   : > { %1374 = vmatprep.mubr.msk.bf16.mxu1 (!%p216_p9), %vm1626_vm2, %v1624_v23  ;;  %1314 = vmatprep.subr.msk.bf16.mxu0 (!%p216_p9), %vm318_vm1, %v1312_v22  ;;  %v320_v27 = vsel (!%p216_p9), %vm318_vm1, %v1311_v24, 0  ;;  %s1628_s29 = smov (!%p216_p9), 64   ;;  %s1629_s17 = smov (!%p216_p9), 32   ;;  %vm1156_vm5 = vcmask (!%p216_p9), 57344   ;;  %vm1162_vm6 = vcmask (!%p216_p9), 123969   ;;  %vm1167_vm7 = vcmask (!%p216_p9), 190594  }
  0x11   : > { %1373 = vmatpush3.bf16.msra.mxu1 (!%p216_p9), %v326_v26  ;;  %329 = vmatpush1.bf16.msra.mxu0 (!%p216_p9), %v320_v27  ;;  %s242_s15 = sand.u32 (!%p216_p9), 1, %s1614_s22   ;;  %s1630_s16 = smov (!%p216_p9), 8   ;;  %vm1172_vm8 = vcmask (!%p216_p9), 257219   ;;  %vm1177_vm9 = vcmask (!%p216_p9), 323844   ;;  %vm1182_vm10 = vcmask (!%p216_p9), 390469   ;;  %vm1187_vm11 = vcmask (!%p216_p9), 457094  }
  0x12   : > { %1384 = vmatprep.subr.bf16.mxu1 (!%p216_p9), %v1624_v23  ;;  %1378 = vmatprep.subr.bf16.mxu0 (!%p216_p9), %v1624_v23  ;;  %s1897_s18 = scalar_lea.vmem (!%p216_p9), [#allocation2], %s242_s15  ;;  %s1631_s19 = smov (!%p216_p9), 48   ;;  %vm1192_vm12 = vcmask (!%p216_p9), 523719   ;;  %vm1198_vm13 = vcmask (!%p216_p9), 582144   ;;  %vm1203_vm14 = vcmask (!%p216_p9), 648769   ;;  %vm1208_vm15 = vcmask (!%p216_p9), 715394  }
  0x13   : > { %s1632_s20 = smov (!%p216_p9), 16   ;;  %s1633_s26 = smov (!%p216_p9), 24   ;;  %vm1218_vm1 = vcmask (!%p216_p9), 848644  }
  0x14   : > { %s1637_s11 = smov (!%p216_p9), 72   ;;  %s1638_s12 = smov (!%p216_p9), 112  }
  0x15   : > { %s245_s9 = scalar_select %p244_p10, %s1699_s25, 1 }
  0x16   : > { %s1640_s14 = smov 104  }
  0x17   : > { %s1341_s10 = sshll.u32 %s245_s9, 4  ;;  %s1634_s9 = smov 40  }
  0x18   : > { %s248_s13 = scalar_lea.vmem %s1967_s0, %s1341_s10  ;;  %s1636_s10 = smov 56  }
  0x19   : > { %v1731_v0 = vld [vmem:[%s248_s13] sm:$0xff]  ;;  %v1733_v1 = vld [vmem:[%s248_s13 + $0x8] sm:$0xff]  ;;  %s1639_s13 = smov 88  }
  0x1a   : > { %v253_v2 = vsel %vm252_vm0, %v1731_v0, 0.0  ;;  %v254_v3 = vsel %vm252_vm0, %v1733_v1, 0.0 }
  0x1b   : > { %v255_v4 = vadd.f32 %v254_v3, %v253_v2 }
  0x1d   : > { %256 = vadd.xlane.f32.xlu0 %v255_v4 }
  0xaa   : > { %v257_v5 = vpop.xlane.xlu0 %256 }
  0xab   : > { %v258_v6 = vrot.slane %v257_v5, 4 }
  0xad   : > { %v259_v7 = vadd.f32 %v258_v6, %v257_v5 }
  0xaf   : > { %v260_v8 = vrot.slane %v259_v7, 2 }
  0xb1   : > { %v261_v9 = vadd.f32 %v260_v8, %v259_v7 }
  0xb3   : > { %v262_v10 = vrot.slane %v261_v9, 1 }
  0xb5   : > { %v263_v11 = vadd.f32 %v262_v10, %v261_v9 }
  0xb7   : > { %v265_v12 = vmul.f32 0.0078125, %v263_v11 }
  0xb9   : > { %v266_v13 = vsub.f32 %v1731_v0, %v265_v12  ;;  %v267_v14 = vsub.f32 %v1733_v1, %v265_v12 }
  0xbb   : > { %v268_v15 = vmul.f32 %v266_v13, %v266_v13  ;;  %v269_v16 = vmul.f32 %v267_v14, %v267_v14 }
  0xbd   : > { %v270_v17 = vsel %vm252_vm0, %v268_v15, 0.0  ;;  %v271_v18 = vsel %vm252_vm0, %v269_v16, 0.0 }
  0xbe   : > { %v272_v19 = vadd.f32 %v271_v18, %v270_v17 }
  0xc0   : > { %273 = vadd.xlane.f32.xlu0 %v272_v19 }
 0x14d   : > { %v274_v28 = vpop.xlane.xlu0 %273 }
 0x14e   : > { %v275_v29 = vrot.slane %v274_v28, 4 }
 0x150   : > { %v276_v30 = vadd.f32 %v275_v29, %v274_v28 }
 0x152   : > { %v277_v31 = vrot.slane %v276_v30, 2 }
 0x154   : > { %v278_v32 = vadd.f32 %v277_v31, %v276_v30 }
 0x156   : > { %v279_v33 = vrot.slane %v278_v32, 1 }
 0x158   : > { %v280_v34 = vadd.f32 %v279_v33, %v278_v32 }
 0x15a   : > { %v281_v35 = vmul.f32 0.0078125, %v280_v34 }
 0x15c   : > { %v282_v36 = vadd.f32 1e-05, %v281_v35 }
 0x15e   : > { %1526 = vrsqrt.f32 %v282_v36 }
 0x168   : > { %v1527_v37 = vpop.eup %1526 }
 0x169   : > { %v284_v39 = vmul.f32 %v1527_v37, %v266_v13  ;;  %v285_v40 = vmul.f32 %v1527_v37, %v267_v14 }
 0x16b   : > { %v293_v42 = vmul.f32 %v1309_v38, %v284_v39  ;;  %v294_v43 = vmul.f32 %v1309_v38, %v285_v40  ;;  %v1520_v40 = vld [vmem:[%s1971_s4 + $0x10] sm:$0xff]  }
 0x16d   : > { %v302_v44 = vadd.f32 %v1310_v41, %v293_v42  ;;  %v303_v45 = vadd.f32 %v1310_v41, %v294_v43  ;;  %v1521_v41 = vld [vmem:[%s1971_s4 + $0x18] sm:$0xff]  }
 0x16f   : > { %v304_v46 = vpack.c.bf16 %v303_v45, %v302_v44 }
 0x171   : > { %1315 = vmatmul.mubr.msk.bf16.vlgmr.msra.gmra.mrb[0].mxu0 %vm252_vm0, %v304_v46  ;;  %1375 = vmatmul.mubr.msk.bf16.vlgmr.msra.gmra.mrb[0].mxu1 %vm252_vm0, %v304_v46  ;;  %vm1213_vm0 = vcmask 782019  }
 0x172   : > { %1380 = vmatprep.mubr.msk.bf16.mxu0 %vm1626_vm2, %v1624_v23  ;;  %1386 = vmatprep.mubr.msk.bf16.mxu1 %vm1626_vm2, %v1624_v23 }
 0x244   : > { %v362_v47 = vpop.f32.mrb[0].mxu0  ;;  %v405_v48 = vpop.f32.mrb[0].mxu1 }
 0x245   : > { %v364_v49 = vpop.f32.mrb[1].mxu0  ;;  %v1376_v50 = vpop.f32.mrb[1].mxu1 }
 0x246   : > { %v366_v51 = vpop.f32.mrb[2].mxu0  ;;  %v408_v52 = vpop.f32.mrb[2].mxu1 }
 0x247   : > { %v1766_v53 = vpack.c.bf16 %v366_v51, %v362_v47  ;;  %v1768_v54 = vpack.c.bf16 %v408_v52, %v405_v48  ;;  %v368_v55 = vpop.f32.mrb[3].mxu0  ;;  %v1377_v56 = vpop.f32.mrb[3].mxu1  ;;  %v1519_v51 = vld [vmem:[%s1971_s4 + $0x8] sm:$0xff]  }
 0x248   : > { %v1770_v57 = vpack.c.bf16 %v368_v55, %v364_v49  ;;  %v1518_v49 = vld [vmem:[%s1971_s4] sm:$0xff]  }
 0x249   : > { %1385 = vmatpush3.bf16.msra.mxu1 %v1768_v54 }
 0x24a   : > { %540 = vrot.lane.b32.xlu1 %v1770_v57, %s1627_s28  ;;  %v420_v58 = vsel %vm415_vm3, %v1770_v57, 0  ;;  %1396 = vmatprep.subr.bf16.mxu1 %v1624_v23 }
 0x24b   : > { %1379 = vmatpush3.bf16.xpose.msra.mxu0 %v420_v58 }
 0x24c   : > { %1390 = vmatprep.subr.bf16.mxu0 %v1624_v23 }
 0x24e   : > { %537 = vrot.lane.b32.xlu1 %v1766_v53, %s1627_s28 }
 0x252   : > { %1381 = vmatmul.mubr.msk.bf16.vlgmr.msra.gmra.mrb[4].mxu0 %vm415_vm3, %v1766_v53 }
 0x253   : > { %1392 = vmatprep.mubr.msk.bf16.mxu0 %vm1626_vm2, %v1624_v23 }
 0x2bc   : > { %v541_v59 = vpop.permute.xlu1 %540 }
 0x2bd   : > { %v546_v60 = vsel %vm415_vm3, %v541_v59, 0 }
 0x2be   : > { %1391 = vmatpush3.bf16.xpose.msra.mxu0 %v546_v60 }
 0x2bf   : > { %1402 = vmatprep.subr.bf16.mxu0 %v1624_v23 }
 0x2c0   : > { %v538_v61 = vpop.permute.xlu1 %537 }
 0x2c5   : > { %1393 = vmatmul.mubr.msk.bf16.vlgmr.msra.gmra.mrb[8].mxu0 %vm415_vm3, %v538_v61 }
 0x2c6   : > { %1406 = vmatprep.mubr.msk.bf16.mxu0 %vm1626_vm2, %v1624_v23  ;;  %1403 = vmatpush3.bf16.msra.mxu0 %v1520_v40 }
 0x2c7   : > { %1404 = vmatprep.subr.bf16.mxu0 %v1624_v23 }
 0x2ca   : > { %1405 = vmatpush3.bf16.msra.mxu0 %v1521_v41 }
 0x2cb   : > { %1418 = vmatprep.subr.bf16.mxu0 %v1624_v23 }
 0x325   : > { %v456_v62 = vpop.f32.mrb[4].mxu0 }
 0x326   : > { %v1382_v63 = vpop.f32.mrb[5].mxu0  ;;  %v464_v2 = vsel %vm463_vm4, %v456_v62, -inf }
 0x327   : > { %465 = vmax.xlane.f32.xlu0 %v464_v2  ;;  %v459_v3 = vpop.f32.mrb[6].mxu0 }
 0x328   : > { %v1383_v4 = vpop.f32.mrb[7].mxu0  ;;  %v467_v5 = vsel %vm463_vm4, %v459_v3, -inf }
 0x329   : > { %468 = vmax.xlane.f32.xlu1 %v467_v5 }
 0x33a   : > { %779 = vrot.lane.b32.xlu1 %v1770_v57, %s1628_s29 }
 0x398   : > { %v582_v6 = vpop.f32.mrb[8].mxu0 }
 0x399   : > { %v1394_v7 = vpop.f32.mrb[9].mxu0  ;;  %v589_v8 = vsel %vm463_vm4, %v582_v6, -inf }
 0x39a   : > { %590 = vmax.xlane.f32.xlu0 %v589_v8  ;;  %v585_v9 = vpop.f32.mrb[10].mxu0 }
 0x39b   : > { %v1395_v10 = vpop.f32.mrb[11].mxu0  ;;  %v592_v11 = vsel %vm463_vm4, %v585_v9, -inf }
 0x39e   : > { %593 = vmax.xlane.f32.xlu0 %v592_v11 }
 0x3b4   : > { %v466_v12 = vpop.xlane.xlu0 %465 }
 0x3b5   : > { %v470_v13 = vsub.f32 %v456_v62, %v466_v12 }
 0x3b6   : > { %v469_v14 = vpop.xlane.xlu1 %468 }
 0x3b7   : > { %v472_v15 = vmul.f32 1.442695, %v470_v13  ;;  %v471_v16 = vsub.f32 %v459_v3, %v469_v14 }
 0x3b9   : > { %1528 = vpow2.f32 %v472_v15  ;;  %v474_v17 = vmul.f32 1.442695, %v471_v16 }
 0x3ba   : > { %v780_v62 = vpop.permute.xlu1 %779 }
 0x3bb   : > { %1530 = vpow2.f32 %v474_v17  ;;  %v785_v4 = vsel %vm415_vm3, %v780_v62, 0 }
 0x3c3   : > { %v1529_v18 = vpop.eup %1528 }
 0x3c4   : > { %v476_v19 = vsel %vm463_vm4, %v1529_v18, 0.0 }
 0x3c5   : > { %v1531_v20 = vpop.eup %1530  ;;  %477 = vadd.xlane.f32.xlu0 %v476_v19 }
 0x3c6   : > { %v479_v21 = vsel %vm463_vm4, %v1531_v20, 0.0 }
 0x3c9   : > { %480 = vadd.xlane.f32.xlu0 %v479_v21 }
 0x427   : > { %v591_v22 = vpop.xlane.xlu0 %590 }
 0x428   : > { %v595_v24 = vsub.f32 %v582_v6, %v591_v22 }
 0x42a   : > { %v597_v25 = vmul.f32 1.442695, %v595_v24 }
 0x42b   : > { %v594_v26 = vpop.xlane.xlu0 %593 }
 0x42c   : > { %1532 = vpow2.f32 %v597_v25  ;;  %v596_v27 = vsub.f32 %v585_v9, %v594_v26 }
 0x42e   : > { %v599_v28 = vmul.f32 1.442695, %v596_v27 }
 0x430   : > { %1534 = vpow2.f32 %v599_v28 }
 0x436   : > { %v1533_v29 = vpop.eup %1532 }
 0x437   : > { %v601_v30 = vsel %vm463_vm4, %v1533_v29, 0.0 }
 0x438   : > { %602 = vadd.xlane.f32.xlu0 %v601_v30 }
 0x43a   : > { %v1535_v31 = vpop.eup %1534 }
 0x43b   : > { %v604_v32 = vsel %vm463_vm4, %v1535_v31, 0.0 }
 0x43c   : > { %605 = vadd.xlane.f32.xlu0 %v604_v32 }
 0x452   : > { %613 = vrot.lane.b32.xlu0 %v1768_v54, %s1627_s28  ;;  %v478_v33 = vpop.xlane.xlu0 %477 }
 0x453   : > { %1536 = vrcp.f32 %v478_v33 }
 0x456   : > { %777 = vrot.lane.b32.xlu0 %v1766_v53, %s1628_s29  ;;  %v481_v34 = vpop.xlane.xlu0 %480 }
 0x457   : > { %1538 = vrcp.f32 %v481_v34 }
 0x45d   : > { %v1537_v35 = vpop.eup %1536 }
 0x45e   : > { %v484_v37 = vmul.f32 %v1537_v35, %v1529_v18 }
 0x461   : > { %v1539_v36 = vpop.eup %1538 }
 0x462   : > { %v485_v38 = vmul.f32 %v1539_v36, %v1531_v20 }
 0x464   : > { %v486_v39 = vpack.c.bf16 %v485_v38, %v484_v37 }
 0x466   : > { %1387 = vmatmul.mubr.msk.bf16.vlgmr.msra.gmra.mrb[4].mxu1 %vm463_vm4, %v486_v39 }
 0x467   : > { %1398 = vmatprep.mubr.msk.bf16.mxu1 %vm1626_vm2, %v1624_v23 }
 0x4c5   : > { %v603_v42 = vpop.xlane.xlu0 %602 }
 0x4c6   : > { %1540 = vrcp.f32 %v603_v42 }
 0x4c9   : > { %v606_v43 = vpop.xlane.xlu0 %605 }
 0x4ca   : > { %1542 = vrcp.f32 %v606_v43  ;;  %v1523_v43 = vld [vmem:[%s1971_s4 + $0x28] sm:$0xff]  }
 0x4cd   : > { %v614_v44 = vpop.permute.xlu0 %613 }
 0x4ce   : > { %1397 = vmatpush3.bf16.msra.mxu1 %v614_v44 }
 0x4cf   : > { %1410 = vmatprep.subr.bf16.mxu1 %v1624_v23 }
 0x4d0   : > { %v1541_v45 = vpop.eup %1540 }
 0x4d1   : > { %v609_v47 = vmul.f32 %v1541_v45, %v1533_v29  ;;  %v778_v5 = vpop.permute.xlu0 %777 }
 0x4d4   : > { %v1543_v46 = vpop.eup %1542 }
 0x4d5   : > { %v610_v48 = vmul.f32 %v1543_v46, %v1535_v31 }
 0x4d7   : > { %v611_v50 = vpack.c.bf16 %v610_v48, %v609_v47 }
 0x4d9   : > { %1399 = vmatmul.mubr.msk.bf16.vlgmr.msra.gmra.mrb[8].mxu1 %vm463_vm4, %v611_v50 }
 0x4da   : > { %1411 = vmatpush3.bf16.msra.mxu1 %v1518_v49  ;;  %1414 = vmatprep.mubr.msk.bf16.mxu1 %vm1626_vm2, %v1624_v23 }
 0x4db   : > { %1412 = vmatprep.subr.bf16.mxu1 %v1624_v23 }
 0x4de   : > { %1413 = vmatpush3.bf16.msra.mxu1 %v1519_v51 }
 0x4df   : > { %1424 = vmatprep.subr.bf16.mxu1 %v1624_v23 }
 0x539   : > { %v524_v52 = vpop.f32.mrb[4].mxu1 }
 0x53a   : > { %v1388_v55 = vpop.f32.mrb[5].mxu1 }
 0x53b   : > { %v527_v56 = vpop.f32.mrb[6].mxu1 }
 0x53c   : > { %v535_v58 = vpack.c.bf16 %v527_v56, %v524_v52  ;;  %v1389_v59 = vpop.f32.mrb[7].mxu1 }
 0x53e   : > { %1415 = vmatmul.mubr.msk.bf16.vlgmr.msra.gmra.mrb[12].mxu1 %vm415_vm3, %v535_v58 }
 0x53f   : > { %1426 = vmatprep.mubr.msk.bf16.mxu1 %vm1626_vm2, %v1624_v23 }
 0x5ac   : > { %v653_v60 = vpop.f32.mrb[8].mxu1 }
 0x5ad   : > { %v1400_v61 = vpop.f32.mrb[9].mxu1 }
 0x5ae   : > { %v656_v63 = vpop.f32.mrb[10].mxu1 }
 0x5af   : > { %v664_v2 = vpack.c.bf16 %v656_v63, %v653_v60  ;;  %v1401_v3 = vpop.f32.mrb[11].mxu1 }
 0x5b1   : > { %1407 = vmatmul.mubr.msk.bf16.vlgmr.msra.gmra.mrb[12].mxu0 %vm415_vm3, %v664_v2 }
 0x5b2   : > { %1419 = vmatpush3.bf16.xpose.msra.mxu0 %v785_v4  ;;  %1420 = vmatprep.mubr.msk.bf16.mxu0 %vm1626_vm2, %v1624_v23 }
 0x5b3   : > { %1430 = vmatprep.subr.bf16.mxu0 %v1624_v23 }
 0x5b9   : > { %1421 = vmatmul.mubr.msk.bf16.vlgmr.msra.gmra.mrb[16].mxu0 %vm415_vm3, %v778_v5 }
 0x5ba   : > { %1434 = vmatprep.mubr.msk.bf16.mxu0 %vm1626_vm2, %v1624_v23 }
 0x611   : > { %v770_v6 = vpop.f32.mrb[12].mxu1 }
 0x612   : > { %v1416_v7 = vpop.f32.mrb[13].mxu1 }
 0x613   : > { %v773_v8 = vpop.f32.mrb[14].mxu1 }
 0x614   : > { %v1417_v9 = vpop.f32.mrb[15].mxu1 }
 0x684   : > { %v714_v10 = vpop.f32.mrb[12].mxu0 }
 0x685   : > { %v1838_v11 = vadd.f32 %v770_v6, %v714_v10  ;;  %v1408_v12 = vpop.f32.mrb[13].mxu0  ;;  %v1524_v6 = vld [vmem:[%s1971_s4 + $0x30] sm:$0xff]  }
 0x686   : > { %v717_v13 = vpop.f32.mrb[14].mxu0 }
 0x687   : > { %v1840_v14 = vadd.f32 %v773_v8, %v717_v13  ;;  %v1409_v15 = vpop.f32.mrb[15].mxu0 }
 0x68c   : > { %v821_v16 = vpop.f32.mrb[16].mxu0 }
 0x68d   : > { %v1422_v17 = vpop.f32.mrb[17].mxu0  ;;  %v828_v18 = vsel %vm463_vm4, %v821_v16, -inf }
 0x68e   : > { %829 = vmax.xlane.f32.xlu1 %v828_v18  ;;  %v824_v19 = vpop.f32.mrb[18].mxu0 }
 0x68f   : > { %v1423_v20 = vpop.f32.mrb[19].mxu0  ;;  %v831_v21 = vsel %vm463_vm4, %v824_v19, -inf }
 0x690   : > { %832 = vmax.xlane.f32.xlu0 %v831_v21 }
 0x69f   : > { %851 = vrot.lane.b32.xlu1 %v1768_v54, %s1628_s29 }
 0x6a3   : > { %961 = vrot.lane.b32.xlu1 %v1766_v53, %s1629_s17  ;;  %v1522_v53 = vld [vmem:[%s1971_s4 + $0x20] sm:$0xff]  }
 0x6a4   : > { %1431 = vmatpush3.bf16.msra.mxu0 %v1522_v53 }
 0x6a5   : > { %1432 = vmatprep.subr.bf16.mxu0 %v1624_v23 }
 0x6a8   : > { %1433 = vmatpush3.bf16.msra.mxu0 %v1523_v43 }
 0x6a9   : > { %1444 = vmatprep.subr.bf16.mxu0 %v1624_v23 }
 0x71b   : > { %v830_v22 = vpop.xlane.xlu1 %829 }
 0x71c   : > { %v834_v24 = vsub.f32 %v821_v16, %v830_v22 }
 0x71d   : > { %v833_v25 = vpop.xlane.xlu0 %832 }
 0x71e   : > { %v836_v26 = vmul.f32 1.442695, %v834_v24  ;;  %v835_v27 = vsub.f32 %v824_v19, %v833_v25 }
 0x71f   : > { %v852_v28 = vpop.permute.xlu1 %851 }
 0x720   : > { %1544 = vpow2.f32 %v836_v26  ;;  %v838_v29 = vmul.f32 1.442695, %v835_v27  ;;  %1425 = vmatpush3.bf16.msra.mxu1 %v852_v28  ;;  %v1337_v27 = vld [vmem:[%s1972_s5] ss:$0 sm:$0xff] }
 0x721   : > { %1438 = vmatprep.subr.bf16.mxu1 %v1624_v23 }
 0x722   : > { %1546 = vpow2.f32 %v838_v29 }
 0x72a   : > { %v1545_v30 = vpop.eup %1544 }
 0x72b   : > { %v840_v31 = vsel %vm463_vm4, %v1545_v30, 0.0 }
 0x72c   : > { %v1547_v32 = vpop.eup %1546  ;;  %841 = vadd.xlane.f32.xlu0 %v840_v31 }
 0x72d   : > { %v843_v33 = vsel %vm463_vm4, %v1547_v32, 0.0 }
 0x730   : > { %844 = vadd.xlane.f32.xlu0 %v843_v33 }
 0x746   : > { %963 = vrot.lane.b32.xlu0 %v1770_v57, %s1629_s17  ;;  %v962_v57 = vpop.permute.xlu1 %961 }
 0x7b9   : > { %v842_v34 = vpop.xlane.xlu0 %841 }
 0x7ba   : > { %1548 = vrcp.f32 %v842_v34 }
 0x7bd   : > { %v845_v35 = vpop.xlane.xlu0 %844 }
 0x7be   : > { %1550 = vrcp.f32 %v845_v35 }
 0x7c1   : > { %v964_v40 = vpop.permute.xlu0 %963 }
 0x7c2   : > { %v969_v42 = vsel %vm415_vm3, %v964_v40, 0 }
 0x7c4   : > { %v1549_v36 = vpop.eup %1548 }
 0x7c5   : > { %v848_v38 = vmul.f32 %v1549_v36, %v1545_v30 }
 0x7c8   : > { %v1551_v37 = vpop.eup %1550 }
 0x7c9   : > { %v849_v39 = vmul.f32 %v1551_v37, %v1547_v32 }
 0x7cb   : > { %v850_v41 = vpack.c.bf16 %v849_v39, %v848_v38 }
 0x7cd   : > { %1427 = vmatmul.mubr.msk.bf16.vlgmr.msra.gmra.mrb[16].mxu1 %vm463_vm4, %v850_v41 }
 0x7ce   : > { %1439 = vmatpush3.bf16.xpose.msra.mxu1 %v969_v42  ;;  %1440 = vmatprep.mubr.msk.bf16.mxu1 %vm1626_vm2, %v1624_v23 }
 0x7cf   : > { %1450 = vmatprep.subr.bf16.mxu1 %v1624_v23 }
 0x7d5   : > { %1441 = vmatmul.mubr.msk.bf16.vlgmr.msra.gmra.mrb[20].mxu1 %vm415_vm3, %v962_v57 }
 0x7d6   : > { %1454 = vmatprep.mubr.msk.bf16.mxu1 %vm1626_vm2, %v1624_v23  ;;  %1451 = vmatpush3.bf16.msra.mxu1 %v1524_v6 }
 0x7d7   : > { %1452 = vmatprep.subr.bf16.mxu1 %v1624_v23 }
 0x8a0   : > { %v891_v44 = vpop.f32.mrb[16].mxu1 }
 0x8a1   : > { %v1428_v45 = vpop.f32.mrb[17].mxu1 }
 0x8a2   : > { %v894_v46 = vpop.f32.mrb[18].mxu1 }
 0x8a3   : > { %v902_v47 = vpack.c.bf16 %v894_v46, %v891_v44  ;;  %v1429_v48 = vpop.f32.mrb[19].mxu1 }
 0x8a5   : > { %1435 = vmatmul.mubr.msk.bf16.vlgmr.msra.gmra.mrb[20].mxu0 %vm415_vm3, %v902_v47 }
 0x8a6   : > { %1446 = vmatprep.mubr.msk.bf16.mxu0 %vm1626_vm2, %v1624_v23  ;;  %vm1223_vm2 = vcmask 915269  }
 0x8a8   : > { %v1005_v49 = vpop.f32.mrb[20].mxu1 }
 0x8a9   : > { %v1442_v50 = vpop.f32.mrb[21].mxu1  ;;  %v1012_v51 = vsel %vm463_vm4, %v1005_v49, -inf }
 0x8aa   : > { %1013 = vmax.xlane.f32.xlu1 %v1012_v51  ;;  %v1008_v52 = vpop.f32.mrb[22].mxu1 }
 0x8ab   : > { %v1443_v55 = vpop.f32.mrb[23].mxu1  ;;  %v1015_v56 = vsel %vm463_vm4, %v1008_v52, -inf }
 0x8ac   : > { %1016 = vmax.xlane.f32.xlu0 %v1015_v56 }
 0x937   : > { %v1014_v58 = vpop.xlane.xlu1 %1013 }
 0x938   : > { %v1018_v59 = vsub.f32 %v1005_v49, %v1014_v58 }
 0x939   : > { %v1017_v60 = vpop.xlane.xlu0 %1016 }
 0x93a   : > { %v1020_v61 = vmul.f32 1.442695, %v1018_v59  ;;  %v1019_v62 = vsub.f32 %v1008_v52, %v1017_v60 }
 0x93c   : > { %1552 = vpow2.f32 %v1020_v61  ;;  %v1022_v63 = vmul.f32 1.442695, %v1019_v62 }
 0x93e   : > { %1554 = vpow2.f32 %v1022_v63 }
 0x946   : > { %v1553_v2 = vpop.eup %1552 }
 0x947   : > { %v1024_v3 = vsel %vm463_vm4, %v1553_v2, 0.0 }
 0x948   : > { %v1555_v4 = vpop.eup %1554  ;;  %1025 = vadd.xlane.f32.xlu0 %v1024_v3 }
 0x949   : > { %v1027_v5 = vsel %vm463_vm4, %v1555_v4, 0.0 }
 0x94a   : > { %1028 = vadd.xlane.f32.xlu1 %v1027_v5 }
 0x95e   : > { %1035 = vrot.lane.b32.xlu0 %v1768_v54, %s1629_s17 }
 0x978   : > { %v952_v7 = vpop.f32.mrb[20].mxu0 }
 0x979   : > { %v959_v8 = vadd.f32 %v952_v7, %v1838_v11  ;;  %v1436_v9 = vpop.f32.mrb[21].mxu0  ;;  %v1525_v11 = vld [vmem:[%s1971_s4 + $0x38] sm:$0xff]  }
 0x97a   : > { %v955_v10 = vpop.f32.mrb[22].mxu0  ;;  %1453 = vmatpush3.bf16.msra.mxu1 %v1525_v11 }
 0x97b   : > { %v960_v12 = vadd.f32 %v955_v10, %v1840_v14  ;;  %v1437_v13 = vpop.f32.mrb[23].mxu0 }
 0x9d5   : > { %v1026_v15 = vpop.xlane.xlu0 %1025 }
 0x9d6   : > { %1556 = vrcp.f32 %v1026_v15 }
 0x9d7   : > { %v1029_v16 = vpop.xlane.xlu1 %1028 }
 0x9d8   : > { %1558 = vrcp.f32 %v1029_v16 }
 0x9d9   : > { %v1036_v54 = vpop.permute.xlu0 %1035 }
 0x9da   : > { %1445 = vmatpush3.bf16.msra.mxu0 %v1036_v54 }
 0x9e0   : > { %v1557_v17 = vpop.eup %1556 }
 0x9e1   : > { %v1032_v19 = vmul.f32 %v1557_v17, %v1553_v2 }
 0x9e2   : > { %v1559_v18 = vpop.eup %1558 }
 0x9e3   : > { %v1033_v20 = vmul.f32 %v1559_v18, %v1555_v4 }
 0x9e5   : > { %v1034_v23 = vpack.c.bf16 %v1033_v20, %v1032_v19 }
 0x9e7   : > { %1447 = vmatmul.mubr.msk.bf16.vlgmr.msra.gmra.mrb[24].mxu0 %vm463_vm4, %v1034_v23  ;;  %vm1233_vm4 = vcmask 1048519  }
 0xaba   : > { %v1075_v14 = vpop.f32.mrb[24].mxu0 }
 0xabb   : > { %v1448_v21 = vpop.f32.mrb[25].mxu0 }
 0xabc   : > { %v1078_v22 = vpop.f32.mrb[26].mxu0 }
 0xabd   : > { %v1086_v24 = vpack.c.bf16 %v1078_v22, %v1075_v14  ;;  %v1449_v25 = vpop.f32.mrb[27].mxu0 }
 0xabf   : > { %1455 = vmatmul.mubr.msk.bf16.vlgmr.msra.gmra.mrb[24].mxu1 %vm415_vm3, %v1086_v24  ;;  %vm1228_vm3 = vcmask 981894  }
 0xb92   : > { %v1136_v26 = vpop.f32.mrb[24].mxu1 }
 0xb93   : > { %v1143_v28 = vadd.f32 %v1136_v26, %v959_v8  ;;  %v1456_v29 = vpop.f32.mrb[25].mxu1 }
 0xb94   : > { %v1139_v30 = vpop.f32.mrb[26].mxu1 }
 0xb95   : > { %v1152_v31 = vadd.f32 %v1337_v27, %v1143_v28  ;;  %v1144_v32 = vadd.f32 %v1139_v30, %v960_v12  ;;  %v1457_v33 = vpop.f32.mrb[27].mxu1 }
 0xb97   : > { %v1154_v53 = vadd.f32 %v1152_v31, %v1731_v0  ;;  %v1153_v34 = vadd.f32 %v1337_v27, %v1144_v32 }
 0xb99   : > { %1174 = vrot.lane.b32.xlu0 %v1154_v53, %s1629_s17  ;;  %1159 = vrot.lane.b32.xlu1 %v1154_v53, %s1630_s16  ;;  %1157 = vst.msk [vmem:[%s1897_s18] sm:$0x1] %vm1156_vm5, %v1154_v53  ;;  %v1155_v35 = vadd.f32 %v1153_v34, %v1733_v1  ;;  %s1635_s17 = smov 80   ;;  %s1248_s16 = sshll.u32 %s1897_s18, 4  ;;  %s1924_s16 = int_to_ptr.vmem [resolvable:$true] %s1248_s16 }
 0xb9d   : > { %1184 = vrot.lane.b32.xlu0 %v1154_v53, %s1631_s19  ;;  %1164 = vrot.lane.b32.xlu1 %v1154_v53, %s1632_s20 }
 0xba1   : > { %1169 = vrot.lane.b32.xlu1 %v1154_v53, %s1633_s26  ;;  %1195 = vrot.lane.b32.xlu0 %v1155_v35, %s1628_s29  ;;  %s1641_s29 = smov 120  }
 0xba5   : > { %1179 = vrot.lane.b32.xlu1 %v1154_v53, %s1634_s9  ;;  %1205 = vrot.lane.b32.xlu0 %v1155_v35, %s1635_s17  ;;  %s1236_s9 = scalar_lea.sflag [#allocation3], %s242_s15  ;;  %s1642_s17 = smov [#allocation2]  }
 0xba9   : > { %1189 = vrot.lane.b32.xlu1 %v1154_v53, %s1636_s10  ;;  %1215 = vrot.lane.b32.xlu0 %v1155_v35, %s1627_s28  ;;  %s1338_s28 = sshll.u32 %s1699_s25, 4  ;;  %s1560_s25 = scalar_lea.vmem %s1924_s16, 16 }
 0xbaa   : > { %s1922_s26 = scalar_lea.hbm %s1973_s6, %s1338_s28  ;;  %p1561_p11 = scmp.ne.s32.totalorder %s1924_s16, %s1560_s25 }
 0xbab   : > { %s1564_s10 = sshll.u32 %s1642_s17, 4  ;;  %s1565_s10 = int_to_ptr.vmem [resolvable:$false] %s1564_s10 }
 0xbac   : > { %p1562_p12 = pnand %p1561_p11, %p1716_p5  ;;  %p1567_p0 = scmp.lt.s32.totalorder %s1924_s16, %s1565_s10 }
 0xbad   : > { %1200 = vrot.lane.b32.xlu1 %v1155_v35, %s1637_s11  ;;  %1225 = vrot.lane.b32.xlu0 %v1155_v35, %s1638_s12  ;;  %s1566_s11 = scalar_lea.vmem %s1565_s10, 32 }
 0xbae   : > { %p1563_p13 = pneg %p1562_p12  ;;  %p1568_p1 = scmp.lt.s32.totalorder %s1566_s11, %s1560_s25 }
 0xbb0   : > { %p1569_p2 = por %p1568_p1, %p1567_p0 }
 0xbb1   : > { %1210 = vrot.lane.b32.xlu1 %v1155_v35, %s1639_s13 }
 0xbb2   : > { %p1570_p3 = pnand %p1569_p2, %p1563_p13 }
 0xbb5   : > { %1220 = vrot.lane.b32.xlu1 %v1155_v35, %s1640_s14 }
 0xbb9   : > { %1230 = vrot.lane.b32.xlu1 %v1155_v35, %s1641_s29 }
 0xc0b   : > { %v1175_v0 = vpop.permute.xlu0 %1174  ;;  %v1160_v1 = vpop.permute.xlu1 %1159 }
 0xc0c   : > { %1163 = vst.msk [vmem:[%s1897_s18 - $0x1] sm:$0x2] %vm1162_vm6, %v1160_v1 }
 0xc0f   : > { %v1165_v36 = vpop.permute.xlu1 %1164  ;;  %v1185_v37 = vpop.permute.xlu0 %1184 }
 0xc10   : > { %1168 = vst.msk [vmem:[%s1897_s18 - $0x2] sm:$0x4] %vm1167_vm7, %v1165_v36 }
 0xc13   : > { %v1170_v38 = vpop.permute.xlu1 %1169  ;;  %v1196_v39 = vpop.permute.xlu0 %1195 }
 0xc14   : > { %1173 = vst.msk [vmem:[%s1897_s18 - $0x3] sm:$0x8] %vm1172_vm8, %v1170_v38 }
 0xc15   : > { %1178 = vst.msk [vmem:[%s1897_s18 - $0x4] sm:$0x10] %vm1177_vm9, %v1175_v0 }
 0xc17   : > { %v1180_v40 = vpop.permute.xlu1 %1179  ;;  %v1206_v42 = vpop.permute.xlu0 %1205 }
 0xc18   : > { %1183 = vst.msk [vmem:[%s1897_s18 - $0x5] sm:$0x20] %vm1182_vm10, %v1180_v40 }
 0xc19   : > { %1188 = vst.msk [vmem:[%s1897_s18 - $0x6] sm:$0x40] %vm1187_vm11, %v1185_v37 }
 0xc1b   : > { %v1190_v41 = vpop.permute.xlu1 %1189  ;;  %v1216_v43 = vpop.permute.xlu0 %1215 }
 0xc1c   : > { %1193 = vst.msk [vmem:[%s1897_s18 - $0x7] sm:$0x80] %vm1192_vm12, %v1190_v41 }
 0xc1d   : > { %1199 = vst.msk [vmem:[%s1897_s18] sm:$0x1] %vm1198_vm13, %v1196_v39 }
 0xc1f   : > { %v1201_v57 = vpop.permute.xlu1 %1200  ;;  %v1226_v46 = vpop.permute.xlu0 %1225 }
 0xc20   : > { %1204 = vst.msk [vmem:[%s1897_s18 - $0x1] sm:$0x2] %vm1203_vm14, %v1201_v57 }
 0xc21   : > { %1209 = vst.msk [vmem:[%s1897_s18 - $0x2] sm:$0x4] %vm1208_vm15, %v1206_v42 }
 0xc23   : > { %v1211_v44 = vpop.permute.xlu1 %1210 }
 0xc24   : > { %1214 = vst.msk [vmem:[%s1897_s18 - $0x3] sm:$0x8] %vm1213_vm0, %v1211_v44 }
 0xc25   : > { %1219 = vst.msk [vmem:[%s1897_s18 - $0x4] sm:$0x10] %vm1218_vm1, %v1216_v43 }
 0xc27   : > { %v1221_v45 = vpop.permute.xlu1 %1220 }
 0xc28   : > { %1224 = vst.msk [vmem:[%s1897_s18 - $0x5] sm:$0x20] %vm1223_vm2, %v1221_v45 }
 0xc29   : > { %1229 = vst.msk [vmem:[%s1897_s18 - $0x6] sm:$0x40] %vm1228_vm3, %v1226_v46 }
 0xc2b   : > { %v1231_v47 = vpop.permute.xlu1 %1230 }
 0xc2c   : > { %1234 = vst.msk [vmem:[%s1897_s18 - $0x7] sm:$0x80] %vm1233_vm4, %v1231_v47 }
 0xc2d   : > { %1573 = shalt.err (!%p1570_p3)
}
 0xc2e   : > { %s1574_s15 = scalar_lea.hbm %s1922_s26, 16  ;;  %s1578_s13 = scalar_lea.hbm %s1973_s6, 32 }
 0xc2f   : > { %p1575_p4 = scmp.ne.s32.totalorder %s1922_s26, %s1574_s15  ;;  %p1579_p9 = scmp.lt.u32.totalorder %s1922_s26, %s1973_s6 }
 0xc30   : > { %p1580_p10 = scmp.lt.u32.totalorder %s1578_s13, %s1574_s15  ;;  %p1582_p12 = scmp.lt.u32.totalorder %s1574_s15, %s1922_s26 }
 0xc31   : > { %p1576_p7 = pnand %p1575_p4, %p1716_p5 }
 0xc32   : > { %p1581_p11 = por %p1580_p10, %p1579_p9 }
 0xc33   : > { %p1577_p8 = pneg %p1576_p7 }
 0xc34   : > { %p1583_p13 = por %p1582_p12, %p1581_p11 }
 0xc36   : > { %p1584_p0 = pnand %p1583_p13, %p1577_p8 }
 0xc38   : > { %1587 = shalt.err (!%p1584_p0)
}
 0xc39   : > { %1458 = dma.vmem_to_hbm [thread:$0]  (%p1716_p5), %s1924_s16, 16, %s1922_s26, %s1236_s9  }
 0xc3a PF: > { %p1464_p1 = scmp.ge.s32.totalorder %s1622_s24, 2  ;;  %s1260_s28 = sand.u32 1, %s1610_s21  }
 0xc3b   : > { %s1261_s19 = scalar_lea.sflag [#allocation3], %s1260_s28 }
 0xc3c   : > { %p1461_p2 = pnand %p1464_p1, %p1720_p6 }
 0xc3e   : > { %1605 = dma.done.wait (!%p1461_p2), %s1261_s19, 16  }
 0xc3f   : > { %1607 = vsyncadd (!%p1461_p2), %s1261_s19, 4294967280  ;;  %p16_p3 = scmp.ge.s32.totalorder %s1703_s27, 4   ;;  %s1976_s21 = smov %s1614_s22 }
 0xc40   : > { %s1977_s22 = smov %s1618_s23  ;;  %s1978_s23 = smov %s1714_s30 }
 0xc41   : > { %s1979_s24 = smov %s1703_s27  ;;  %18 = sbr.rel (!%p16_p3) target bundleno = 3 (0x3), region = 79 }
 0xc48   :  { %1265 = vsyncpa [#allocation3], 1 }
 0xc49   :  { %1267 = vsyncpa [#allocation3 + $0x1], 1 }

</bundles_post_ra>
